<compile_context>
chip_gen: v5e
topology: v5e:2x2
jax: 0.10.0
libtpu: 0.0.40
codegen_flags: <defaults>
</compile_context>

<pallas_src>
from functools import partial

import jax
import jax.numpy as jnp
from jax.experimental import pallas as pl
from jax.experimental.pallas import tpu as pltpu

TEXTS = ['gun', 'rifle', 'carabine', 'shotgun', 'pistol', 'handgun', 'revolver']
NUM_CLASSES = len(TEXTS)
NC_PAD = 128            # lane-dense class dimension (7 real classes + zero pad)
PATCH = 8
HIDDEN = 32
THRESHOLD = 0.001


# ----------------------------- Pallas kernel -------------------------------
def owl_kernel(patches_ref, wp_ref, bp_ref, wt_ref, bt_ref, out_ref, *,
               threshold):
    # patches_ref: [M, Din] with M = B*P (whole batch, single invocation)
    x = patches_ref[...]

    # patch embedding (MXU matmul)
    e = jnp.dot(x, wp_ref[...], preferred_element_type=jnp.float32) + bp_ref[...]

    # layernorm over hidden dim (gamma/beta folded into wt_ref/bt_ref)
    mu = jnp.mean(e, axis=-1, keepdims=True)
    var = jnp.mean((e - mu) ** 2, axis=-1, keepdims=True)
    eh = (e - mu) * jax.lax.rsqrt(var + 1e-5)

    # class head: lane-padded to 128 columns; pad columns carry a -1e9 bias so
    # sigmoid(pad) == 0 exactly and can never influence the max.
    logits = jnp.dot(eh, wt_ref[...], preferred_element_type=jnp.float32) + bt_ref[...]
    scores = jax.nn.sigmoid(logits)                        # [M, 128], in (0,1)

    # post_process + ResultWrapper.get_prediction() collapse to:
    #   max over all (query, class) of (score if score > threshold else 0)
    kept = jnp.where(scores > threshold, scores, 0.0)      # VPU select
    out_ref[0, 0] = jnp.max(kept)                          # scalar -> SMEM


# ------------------------------ JAX glue ------------------------------------
def patchify(x, patch):
    """NCHW image -> [B, num_patches, C*patch*patch]."""
    B, C, H, W = x.shape
    gh, gw = H // patch, W // patch
    x = x.reshape(B, C, gh, patch, gw, patch)
    x = x.transpose(0, 2, 4, 1, 3, 5)
    return x.reshape(B, gh * gw, C * patch * patch).astype(jnp.float32)


def init_params(key, in_channels=3, patch=PATCH, hidden=HIDDEN):
    din = in_channels * patch * patch
    k0, k1 = jax.random.split(key, 2)
    return {
        'wp': jax.random.normal(k0, (din, hidden), jnp.float32) * 0.05,
        'bp': jnp.zeros((1, hidden), jnp.float32),
        'gamma': jnp.ones((1, hidden), jnp.float32),
        'beta': jnp.zeros((1, hidden), jnp.float32),
        'wt': jax.random.normal(k1, (hidden, NUM_CLASSES), jnp.float32) * 0.2,
        # TODO(synk): box head of predict() is dead for forward()'s scalar
        # prediction and is intentionally not computed in the kernel.
    }


def fuse_head_params(params, nc_pad=NC_PAD):
    """Fold layernorm affine (gamma, beta) into a lane-padded class head."""
    gamma, beta, wt = params['gamma'], params['beta'], params['wt']
    H, NC = wt.shape
    wt_f = gamma.reshape(H, 1) * wt                        # [H, NC]
    bt_f = beta @ wt                                       # [1, NC]
    wt_pad = jnp.zeros((H, nc_pad), jnp.float32).at[:, :NC].set(wt_f)
    # pad columns get a huge negative bias so sigmoid == 0 there.
    bt_pad = jnp.full((1, nc_pad), -1e9, jnp.float32).at[:, :NC].set(bt_f)
    return wt_pad, bt_pad


def owlvit_forward(x, params, threshold=THRESHOLD):
    """Equivalent of OWLVitWrapper.forward: returns max detection score."""
    B = x.shape[0]
    if B == 0:                      # predict() returns None -> forward returns 0
        return jnp.float32(0.0)

    patches = patchify(x, PATCH)                           # [B, P, Din]
    P, Din = patches.shape[1], patches.shape[2]
    M = B * P
    patches = patches.reshape(M, Din)                      # whole batch, one tile
    wt_pad, bt_pad = fuse_head_params(params)

    vmem = pl.BlockSpec(memory_space=pltpu.MemorySpace.VMEM)
    pred = pl.pallas_call(
        partial(owl_kernel, threshold=threshold),
        in_specs=[vmem, vmem, vmem, vmem, vmem],
        out_specs=pl.BlockSpec(memory_space=pltpu.MemorySpace.SMEM),
        out_shape=jax.ShapeDtypeStruct((1, 1), jnp.float32),
    )(patches, params['wp'], params['bp'], wt_pad, bt_pad)

    # get_prediction() == max over batch/classes of probs == kernel scalar
    return pred[0, 0]


def reference_forward(x, params, threshold=THRESHOLD):
    """Pure-JAX reference with the original (unfused) post-processing math."""
    patches = patchify(x, PATCH)                           # [B, P, Din]
    e = patches @ params['wp'] + params['bp']
    mu = e.mean(-1, keepdims=True)
    var = ((e - mu) ** 2).mean(-1, keepdims=True)
    eh = (e - mu) * jax.lax.rsqrt(var + 1e-5) * params['gamma'] + params['beta']
    scores = jax.nn.sigmoid(eh @ params['wt'])             # [B, P, NC]
    q_max = scores.max(-1)                                 # [B, P]
    label = scores.argmax(-1)                              # [B, P]
    keep = q_max > threshold
    cls = jnp.arange(NUM_CLASSES)
    mask = (label[..., None] == cls) & keep[..., None]     # [B, P, NC]
    probs = jnp.where(mask, q_max[..., None], 0.0).max(1)  # [B, NC]
    return probs.max()


# -------------------------------- main --------------------------------------
if __name__ == "__main__":
    key = jax.random.PRNGKey(0)
    k_img, k_par = jax.random.split(key)

    # batch=2, channels=3, spatial=32x32 -> 16 patches of 8x8 per image
    x = jax.random.uniform(k_img, (2, 3, 32, 32), jnp.float32)
    params = init_params(k_par)

    forward = jax.jit(partial(owlvit_forward, params=params))
    pred = jax.block_until_ready(forward(x))

    ref = reference_forward(x, params)
    assert jnp.allclose(pred, ref, rtol=1e-5, atol=1e-5), (pred, ref)

    print("KERNEL_OK")
</pallas_src>

<mosaic_0001>
module attributes {stable_mosaic.version = 11 : i64} {
  func.func @owl_kernel(%arg0: memref<32x192xf32, #tpu.memory_space<vmem>>, %arg1: memref<192x32xf32, #tpu.memory_space<vmem>>, %arg2: memref<1x32xf32, #tpu.memory_space<vmem>>, %arg3: memref<32x128xf32, #tpu.memory_space<vmem>>, %arg4: memref<1x128xf32, #tpu.memory_space<vmem>>, %arg5: memref<1x1xf32, #tpu.memory_space<smem>>) attributes {dimension_semantics = [], scalar_prefetch = 0 : i64, scratch_operands = 0 : i64, tpu.core_type = #tpu.core_type<tc>} {
    %c0 = arith.constant 0 : index
    %c0_0 = arith.constant 0 : index
    %0 = vector.load %arg0[%c0, %c0_0] : memref<32x192xf32, #tpu.memory_space<vmem>>, vector<32x192xf32>
    %c0_1 = arith.constant 0 : index
    %c0_2 = arith.constant 0 : index
    %1 = vector.load %arg1[%c0_1, %c0_2] : memref<192x32xf32, #tpu.memory_space<vmem>>, vector<192x32xf32>
    %cst = arith.constant dense<0.000000e+00> : vector<32x32xf32>
    %2 = tpu.matmul %0, %1, %cst {dimension_numbers = #tpu.dot_dimension_numbers<[1], [0], [0], [1], [0, 0, 1, 1], [], []>} : vector<32x192xf32>, vector<192x32xf32>, vector<32x32xf32> -> vector<32x32xf32>
    %c0_3 = arith.constant 0 : index
    %c0_4 = arith.constant 0 : index
    %3 = vector.load %arg2[%c0_3, %c0_4] : memref<1x32xf32, #tpu.memory_space<vmem>>, vector<1x32xf32>
    %4 = vector.broadcast %3 : vector<1x32xf32> to vector<32x32xf32>
    %5 = arith.addf %2, %4 : vector<32x32xf32>
    %cst_5 = arith.constant dense<0.000000e+00> : vector<32xf32>
    %6 = vector.multi_reduction <add>, %5, %cst_5 [1] : vector<32x32xf32> to vector<32xf32>
    %7 = vector.shape_cast %6 : vector<32xf32> to vector<32x1xf32>
    %cst_6 = arith.constant 3.200000e+01 : f32
    %8 = vector.broadcast %cst_6 : f32 to vector<32x1xf32>
    %9 = arith.divf %7, %8 : vector<32x1xf32>
    %10 = vector.broadcast %9 : vector<32x1xf32> to vector<32x32xf32>
    %11 = arith.subf %5, %10 : vector<32x32xf32>
    %12 = arith.mulf %11, %11 : vector<32x32xf32>
    %cst_7 = arith.constant dense<0.000000e+00> : vector<32xf32>
    %13 = vector.multi_reduction <add>, %12, %cst_7 [1] : vector<32x32xf32> to vector<32xf32>
    %14 = vector.shape_cast %13 : vector<32xf32> to vector<32x1xf32>
    %cst_8 = arith.constant 3.200000e+01 : f32
    %15 = vector.broadcast %cst_8 : f32 to vector<32x1xf32>
    %16 = arith.divf %14, %15 : vector<32x1xf32>
    %17 = vector.broadcast %9 : vector<32x1xf32> to vector<32x32xf32>
    %18 = arith.subf %5, %17 : vector<32x32xf32>
    %cst_9 = arith.constant 9.99999974E-6 : f32
    %19 = vector.broadcast %cst_9 : f32 to vector<32x1xf32>
    %20 = arith.addf %16, %19 : vector<32x1xf32>
    %21 = math.rsqrt %20 : vector<32x1xf32>
    %22 = vector.broadcast %21 : vector<32x1xf32> to vector<32x32xf32>
    %23 = arith.mulf %18, %22 : vector<32x32xf32>
    %c0_10 = arith.constant 0 : index
    %c0_11 = arith.constant 0 : index
    %24 = vector.load %arg3[%c0_10, %c0_11] : memref<32x128xf32, #tpu.memory_space<vmem>>, vector<32x128xf32>
    %cst_12 = arith.constant dense<0.000000e+00> : vector<32x128xf32>
    %25 = tpu.matmul %23, %24, %cst_12 {dimension_numbers = #tpu.dot_dimension_numbers<[1], [0], [0], [1], [0, 0, 1, 1], [], []>} : vector<32x32xf32>, vector<32x128xf32>, vector<32x128xf32> -> vector<32x128xf32>
    %c0_13 = arith.constant 0 : index
    %c0_14 = arith.constant 0 : index
    %26 = vector.load %arg4[%c0_13, %c0_14] : memref<1x128xf32, #tpu.memory_space<vmem>>, vector<1x128xf32>
    %27 = vector.broadcast %26 : vector<1x128xf32> to vector<32x128xf32>
    %28 = arith.addf %25, %27 : vector<32x128xf32>
    %29 = arith.negf %28 : vector<32x128xf32>
    %30 = math.exp %29 : vector<32x128xf32>
    %cst_15 = arith.constant 1.000000e+00 : f32
    %31 = vector.broadcast %cst_15 : f32 to vector<32x128xf32>
    %32 = arith.addf %31, %30 : vector<32x128xf32>
    %33 = arith.divf %31, %32 : vector<32x128xf32>
    %cst_16 = arith.constant 1.000000e-03 : f32
    %34 = vector.broadcast %cst_16 : f32 to vector<32x128xf32>
    %35 = arith.cmpf ogt, %33, %34 : vector<32x128xf32>
    %cst_17 = arith.constant 0.000000e+00 : f32
    %36 = vector.broadcast %cst_17 : f32 to vector<32x128xf32>
    %37 = arith.select %35, %33, %36 : vector<32x128xi1>, vector<32x128xf32>
    %38 = vector.shape_cast %37 : vector<32x128xf32> to vector<1x32x128xf32>
    %cst_18 = arith.constant dense<0xFF800000> : vector<1xf32>
    %39 = vector.multi_reduction <maximumf>, %38, %cst_18 [1, 2] : vector<1x32x128xf32> to vector<1xf32>
    %40 = vector.shape_cast %39 : vector<1xf32> to vector<1x1x1xf32>
    %41 = vector.extract %40[0, 0, 0] : f32 from vector<1x1x1xf32>
    %c0_19 = arith.constant 0 : index
    %c0_20 = arith.constant 0 : index
    %42 = memref.load %arg5[%c0_19, %c0_20] : memref<1x1xf32, #tpu.memory_space<smem>>
    memref.store %41, %arg5[%c0_19, %c0_20] : memref<1x1xf32, #tpu.memory_space<smem>>
    return
  }
}

</mosaic_0001>

<bundles_post_ra>
// kernel: owlvit_forward.1
= control target key start
LH: loop header
LB: loop body
LE: loop exit
PB: predicated region body
PF: predicated region fallthrough
CT: control target
= control target key end

     0   :  { %s657_s0 = inlined_call_operand.vmem [shape: f32[32,192], index: 0, kind: input, shape index: {}]   ;;  %s658_s1 = inlined_call_operand.vmem [shape: f32[192,32], index: 1, kind: input, shape index: {}]   ;;  %s659_s2 = inlined_call_operand.vmem [shape: f32[1,32], index: 2, kind: input, shape index: {}]   ;;  %s660_s3 = inlined_call_operand.vmem [shape: f32[32,128], index: 3, kind: input, shape index: {}]   ;;  %s661_s4 = inlined_call_operand.vmem [shape: f32[1,128], index: 4, kind: input, shape index: {}]   ;;  %s662_s5 = inlined_call_operand.hbm [shape: f32[1,1], index: 5, kind: output, shape index: {}]  }
   0x1   :  { %v44_v0 = vld [vmem:[%s658_s1 + $0x78] sm:$0xff]  ;;  %v43_v1 = vld [vmem:[%s658_s1 + $0x70] sm:$0xff]  ;;  %v42_v3 = vld [vmem:[%s658_s1 + $0x68] sm:$0xff] }
   0x2   :  { %70 = vmatpush.msra.mxu0 %v44_v0  ;;  %398 = vmatpush.msra.mxu3 %v44_v0  ;;  %v52_v2 = vld [vmem:[%s658_s1 + $0xb8] sm:$0xff]  ;;  %v51_v4 = vld [vmem:[%s658_s1 + $0xb0] sm:$0xff]  ;;  %v50_v5 = vld [vmem:[%s658_s1 + $0xa8] sm:$0xff] }
   0x3   :  { %107 = vmatpush.msra.mxu1 %v52_v2  ;;  %v41_v6 = vld [vmem:[%s658_s1 + $0x60] sm:$0xff]  ;;  %v40_v8 = vld [vmem:[%s658_s1 + $0x58] sm:$0xff]  ;;  %v39_v10 = vld [vmem:[%s658_s1 + $0x50] sm:$0xff] }
   0x4   :  { %71 = vmatpush.msra.mxu0 %v43_v1  ;;  %399 = vmatpush.msra.mxu3 %v43_v1  ;;  %v49_v7 = vld [vmem:[%s658_s1 + $0xa0] sm:$0xff]  ;;  %v48_v9 = vld [vmem:[%s658_s1 + $0x98] sm:$0xff]  ;;  %v47_v11 = vld [vmem:[%s658_s1 + $0x90] sm:$0xff] }
   0x5   :  { %108 = vmatpush.msra.mxu1 %v51_v4  ;;  %v38_v12 = vld [vmem:[%s658_s1 + $0x48] sm:$0xff] }
   0x6   :  { %72 = vmatpush.msra.mxu0 %v42_v3  ;;  %400 = vmatpush.msra.mxu3 %v42_v3  ;;  %v46_v13 = vld [vmem:[%s658_s1 + $0x88] sm:$0xff] }
   0x7   :  { %109 = vmatpush.msra.mxu1 %v50_v5 }
   0x8   :  { %73 = vmatpush.msra.mxu0 %v41_v6  ;;  %401 = vmatpush.msra.mxu3 %v41_v6 }
   0x9   :  { %110 = vmatpush.msra.mxu1 %v49_v7 }
   0xa   :  { %74 = vmatpush.msra.mxu0 %v40_v8  ;;  %402 = vmatpush.msra.mxu3 %v40_v8 }
   0xb   :  { %111 = vmatpush.msra.mxu1 %v48_v9 }
   0xc   :  { %75 = vmatpush.msra.mxu0 %v39_v10  ;;  %403 = vmatpush.msra.mxu3 %v39_v10 }
   0xd   :  { %10 = vsyncpa [#allocation3], 0  ;;  %v37_v14 = vld [vmem:[%s658_s1 + $0x40] sm:$0xff]  ;;  %112 = vmatpush.msra.mxu1 %v47_v11  ;;  %v36_v16 = vld [vmem:[%s658_s1 + $0x38] sm:$0xff]  ;;  %vm57_vm0 = vcmask 523264   ;;  %vm128_vm1 = vcmask 261120  }
   0xe   :  { %76 = vmatpush.msra.mxu0 %v38_v12  ;;  %404 = vmatpush.msra.mxu3 %v38_v12  ;;  %v45_v15 = vld [vmem:[%s658_s1 + $0x80] sm:$0xff]  ;;  %v22_v17 = vld [vmem:[%s657_s0 + $0x8] sm:$0xff]  ;;  %v35_v18 = vld [vmem:[%s658_s1 + $0x30] sm:$0xff]  ;;  %v460_v53 = vmov 32.0   ;;  %s376_s16 = sshll.u32 %s662_s5, 4  ;;  %s461_s18 = smov [#allocation2]   ;;  %s377_s16 = int_to_ptr.hbm [resolvable:$true] %s376_s16 }
   0xf   :  { %113 = vmatpush.msra.mxu1 %v46_v13  ;;  %v34_v19 = vld [vmem:[%s658_s1 + $0x28] sm:$0xff]  ;;  %v33_v20 = vld [vmem:[%s658_s1 + $0x20] sm:$0xff]  ;;  %v32_v21 = vld [vmem:[%s658_s1 + $0x18] sm:$0xff]  ;;  %420 = vrcp.f32 %v460_v53 }
  0x10   :  { %77 = vmatpush.msra.mxu0 %v37_v14  ;;  %405 = vmatpush.msra.mxu3 %v37_v14  ;;  %v24_v22 = vld [vmem:[%s657_s0 + $0x18] sm:$0xff]  ;;  %v31_v23 = vld [vmem:[%s658_s1 + $0x10] sm:$0xff]  ;;  %v30_v24 = vld [vmem:[%s658_s1 + $0x8] sm:$0xff] }
  0x11   :  { %114 = vmatpush.msra.mxu1 %v45_v15  ;;  %v29_v25 = vld [vmem:[%s658_s1] sm:$0xff]  ;;  %v26_v28 = vld [vmem:[%s657_s0 + $0x28] sm:$0xff]  ;;  %v23_v29 = vld [vmem:[%s657_s0 + $0x10] sm:$0xff] }
  0x12   :  { %78 = vmatpush.msra.mxu0 %v36_v16  ;;  %406 = vmatpush.msra.mxu3 %v36_v16  ;;  %v21_v26 = vld [vmem:[%s657_s0] sm:$0xff]  ;;  %v27_v30 = vld [vmem:[%s657_s0 + $0x30] sm:$0xff]  ;;  %v28_v31 = vld [vmem:[%s657_s0 + $0x38] sm:$0xff] }
  0x13   :  { %386 = vmatmul.msk.f32.vlgmr.msra.gmra.mxu1 %vm57_vm0, %v22_v17  ;;  %v25_v27 = vld [vmem:[%s657_s0 + $0x20] sm:$0xff]  ;;  %v227_v16 = vld [vmem:[%s660_s3 + $0x18] sm:$0xff]  ;;  %v226_v17 = vld [vmem:[%s660_s3 + $0x10] sm:$0xff] }
  0x14   :  { %79 = vmatpush.msra.mxu0 %v35_v18  ;;  %407 = vmatpush.msra.mxu3 %v35_v18  ;;  %v418_v34 = vld [vmem:[%s659_s2] ss:$0 sm:$0xff]  ;;  %v225_v18 = vld [vmem:[%s660_s3 + $0x8] sm:$0xff] }
  0x15   :  { %v421_v54 = vpop.eup %420  ;;  %256 = vmatpush.msra.mxu2 %v227_v16 }
  0x16   :  { %80 = vmatpush.msra.mxu0 %v34_v19  ;;  %408 = vmatpush.msra.mxu3 %v34_v19  ;;  %v142_v55 = vmul.f32 32.0, %v421_v54  ;;  %vm146_vm2 = vweird.f32 %v421_v54  ;;  %v224_v19 = vld [vmem:[%s660_s3] sm:$0xff] }
  0x17   :  { %257 = vmatpush.msra.mxu2 %v226_v17 }
  0x18   :  { %81 = vmatpush.msra.mxu0 %v33_v20  ;;  %409 = vmatpush.msra.mxu3 %v33_v20  ;;  %v143_v56 = vsub.f32 1.0, %v142_v55 }
  0x19   :  { %258 = vmatpush.msra.mxu2 %v225_v18 }
  0x1a   :  { %82 = vmatpush.msra.mxu0 %v32_v21  ;;  %410 = vmatpush.msra.mxu3 %v32_v21  ;;  %v144_v57 = vmul.f32 %v421_v54, %v143_v56 }
  0x1b   :  { %387 = vmatmul.msk.f32.gmra.mxu1 %vm57_vm0, %v24_v22  ;;  %259 = vmatpush.msra.mxu2 %v224_v19 }
  0x1c   :  { %83 = vmatpush.msra.mxu0 %v31_v23  ;;  %411 = vmatpush.msra.mxu3 %v31_v23  ;;  %v145_v58 = vadd.f32 %v421_v54, %v144_v57 }
  0x1e   :  { %84 = vmatpush.msra.mxu0 %v30_v24  ;;  %412 = vmatpush.msra.mxu3 %v30_v24  ;;  %v147_v59 = vsel %vm146_vm2, %v421_v54, %v145_v58 }
  0x20   :  { %85 = vmatpush.msra.mxu0 %v29_v25  ;;  %413 = vmatpush.msra.mxu3 %v29_v25 }
  0x21   :  { %86 = vmatmul.f32.vlgmr.msra.gmra.mxu0 %v21_v26  ;;  %92 = vmatmul.f32.vlgmr.msra.gmra.mxu3 %v25_v27 }
  0x23   :  { %388 = vmatmul.msk.f32.gmra.mxu1 %vm57_vm0, %v26_v28 }
  0x29   :  { %89 = vmatmul.f32.gmra.mxu0 %v23_v29  ;;  %95 = vmatmul.f32.gmra.mxu3 %v27_v30 }
  0x2b   :  { %389 = vmatmul.msk.f32.gmra.mxu1 %vm57_vm0, %v28_v31 }
  0x90   :  { %v116_v32 = vpop.f32.mrf.mxu1 }
  0x98   :  { %v119_v33 = vpop.f32.mrf.mxu1 }
  0x9e   :  { %v87_v35 = vpop.f32.mrf.mxu0 }
  0x9f   :  { %v88_v36 = vadd.f32 %v418_v34, %v87_v35 }
  0xa0   :  { %v122_v38 = vpop.f32.mrf.mxu1 }
  0xa1   :  { %v117_v37 = vadd.f32 %v116_v32, %v88_v36 }
  0xa3   :  { %v129_v39 = vsel %vm128_vm1, %v117_v37, 0.0 }
  0xa4   :  { %v93_v40 = vpop.f32.mrf.mxu3  ;;  %130 = vadd.xlane.f32.xlu0 %v129_v39 }
  0xa5   :  { %v94_v41 = vadd.f32 %v418_v34, %v93_v40 }
  0xa6   :  { %v90_v42 = vpop.f32.mrf.mxu0 }
  0xa7   :  { %v91_v43 = vadd.f32 %v418_v34, %v90_v42  ;;  %v123_v44 = vadd.f32 %v122_v38, %v94_v41 }
  0xa8   :  { %v125_v49 = vpop.f32.mrf.mxu1 }
  0xa9   :  { %v135_v45 = vsel %vm128_vm1, %v123_v44, 0.0  ;;  %v120_v46 = vadd.f32 %v119_v33, %v91_v43 }
  0xaa   :  { %136 = vadd.xlane.f32.xlu1 %v135_v45 }
  0xab   :  { %v132_v47 = vsel %vm128_vm1, %v120_v46, 0.0 }
  0xac   :  { %v96_v48 = vpop.f32.mrf.mxu3  ;;  %133 = vadd.xlane.f32.xlu0 %v132_v47 }
  0xad   :  { %v97_v50 = vadd.f32 %v418_v34, %v96_v48 }
  0xaf   :  { %v126_v51 = vadd.f32 %v125_v49, %v97_v50 }
  0xb1   :  { %v138_v52 = vsel %vm128_vm1, %v126_v51, 0.0 }
  0xb2   :  { %139 = vadd.xlane.f32.xlu1 %v138_v52 }
 0x117   :  { %v131_v60 = vpop.xlane.xlu0 %130 }
 0x118   :  { %v148_v61 = vmul.f32 %v147_v59, %v131_v60 }
 0x11a   :  { %v599_v62 = vsub.f32 %v117_v37, %v148_v61 }
 0x11c   :  { %v156_v63 = vmul.f32 %v599_v62, %v599_v62 }
 0x11d   :  { %v137_v0 = vpop.xlane.xlu1 %136 }
 0x11e   :  { %v150_v1 = vmul.f32 %v147_v59, %v137_v0  ;;  %v160_v2 = vsel %vm128_vm1, %v156_v63, 0.0  ;;  %v419_v0 = vld [vmem:[%s661_s4] ss:$0 sm:$0xff] }
 0x11f   :  { %161 = vadd.xlane.f32.xlu2 %v160_v2  ;;  %v134_v3 = vpop.xlane.xlu0 %133 }
 0x120   :  { %v604_v4 = vsub.f32 %v123_v44, %v150_v1  ;;  %v149_v5 = vmul.f32 %v147_v59, %v134_v3 }
 0x122   :  { %v606_v6 = vsub.f32 %v120_v46, %v149_v5  ;;  %v158_v7 = vmul.f32 %v604_v4, %v604_v4 }
 0x124   :  { %v166_v8 = vsel %vm128_vm1, %v158_v7, 0.0  ;;  %v157_v9 = vmul.f32 %v606_v6, %v606_v6 }
 0x125   :  { %v140_v10 = vpop.xlane.xlu1 %139  ;;  %167 = vadd.xlane.f32.xlu0 %v166_v8 }
 0x126   :  { %v151_v11 = vmul.f32 %v147_v59, %v140_v10  ;;  %v163_v12 = vsel %vm128_vm1, %v157_v9, 0.0 }
 0x127   :  { %164 = vadd.xlane.f32.xlu2 %v163_v12 }
 0x128   :  { %v614_v13 = vsub.f32 %v126_v51, %v151_v11 }
 0x12a   :  { %v159_v14 = vmul.f32 %v614_v13, %v614_v13 }
 0x12c   :  { %v169_v15 = vsel %vm128_vm1, %v159_v14, 0.0 }
 0x12d   :  { %170 = vadd.xlane.f32.xlu1 %v169_v15 }
 0x192   :  { %v162_v20 = vpop.xlane.xlu2 %161 }
 0x193   :  { %v172_v21 = vmul.f32 %v162_v20, %v147_v59 }
 0x195   :  { %v176_v22 = vadd.f32 1e-05, %v172_v21 }
 0x197   :  { %422 = vrsqrt.f32 %v176_v22  ;;  %vm186_vm4 = vweird.f32 %v176_v22 }
 0x198   :  { %v168_v23 = vpop.xlane.xlu0 %167 }
 0x199   :  { %v174_v24 = vmul.f32 %v168_v23, %v147_v59 }
 0x19a   :  { %v165_v25 = vpop.xlane.xlu2 %164 }
 0x19b   :  { %v178_v26 = vadd.f32 1e-05, %v174_v24  ;;  %v173_v27 = vmul.f32 %v165_v25, %v147_v59 }
 0x19d   :  { %v423_v28 = vpop.eup %422  ;;  %424 = vrsqrt.f32 %v178_v26  ;;  %v177_v29 = vadd.f32 1e-05, %v173_v27  ;;  %vm206_vm10 = vweird.f32 %v178_v26 }
 0x19e   :  { %v181_v30 = vmul.f32 %v423_v28, %v176_v22  ;;  %vm187_vm3 = vweird.f32 %v423_v28 }
 0x19f   :  { %426 = vrsqrt.f32 %v177_v29  ;;  %vm188_vm5 = vmor %vm186_vm4, %vm187_vm3  ;;  %vm196_vm7 = vweird.f32 %v177_v29 }
 0x1a0   :  { %v182_v31 = vmul.f32 %v423_v28, %v181_v30  ;;  %v171_v32 = vpop.xlane.xlu1 %170 }
 0x1a1   :  { %v175_v33 = vmul.f32 %v171_v32, %v147_v59 }
 0x1a2   :  { %v183_v34 = vmul.f32 0.5, %v182_v31 }
 0x1a3   :  { %v425_v35 = vpop.eup %424  ;;  %v179_v36 = vadd.f32 1e-05, %v175_v33 }
 0x1a4   :  { %v184_v37 = vsub.f32 1.5, %v183_v34  ;;  %v201_v38 = vmul.f32 %v425_v35, %v178_v26  ;;  %vm207_vm9 = vweird.f32 %v425_v35 }
 0x1a5   :  { %v427_v39 = vpop.eup %426  ;;  %428 = vrsqrt.f32 %v179_v36  ;;  %vm208_vm11 = vmor %vm206_vm10, %vm207_vm9  ;;  %vm216_vm13 = vweird.f32 %v179_v36 }
 0x1a6   :  { %v202_v40 = vmul.f32 %v425_v35, %v201_v38  ;;  %v191_v41 = vmul.f32 %v427_v39, %v177_v29  ;;  %v185_v42 = vmul.f32 %v423_v28, %v184_v37  ;;  %vm197_vm6 = vweird.f32 %v427_v39 }
 0x1a7   :  { %vm198_vm8 = vmor %vm196_vm7, %vm197_vm6 }
 0x1a8   :  { %v192_v43 = vmul.f32 %v427_v39, %v191_v41  ;;  %v189_v44 = vsel %vm188_vm5, %v423_v28, %v185_v42  ;;  %v203_v46 = vmul.f32 0.5, %v202_v40 }
 0x1a9   :  { %v220_v45 = vmul.f32 %v189_v44, %v599_v62 }
 0x1aa   :  { %v193_v47 = vmul.f32 0.5, %v192_v43  ;;  %v204_v51 = vsub.f32 1.5, %v203_v46 }
 0x1ab   :  { %v429_v48 = vpop.eup %428  ;;  %390 = vmatmul.msk.f32.vlgmr.msra.gmra.mxu2 %vm128_vm1, %v220_v45 }
 0x1ac   :  { %v194_v49 = vsub.f32 1.5, %v193_v47  ;;  %v211_v50 = vmul.f32 %v429_v48, %v179_v36  ;;  %v205_v57 = vmul.f32 %v425_v35, %v204_v51  ;;  %vm217_vm12 = vweird.f32 %v429_v48 }
 0x1ad   :  { %vm218_vm14 = vmor %vm216_vm13, %vm217_vm12 }
 0x1ae   :  { %v212_v52 = vmul.f32 %v429_v48, %v211_v50  ;;  %v195_v53 = vmul.f32 %v427_v39, %v194_v49  ;;  %v209_v59 = vsel %vm208_vm11, %v425_v35, %v205_v57 }
 0x1af   :  { %v222_v60 = vmul.f32 %v209_v59, %v604_v4 }
 0x1b0   :  { %v199_v54 = vsel %vm198_vm8, %v427_v39, %v195_v53  ;;  %v213_v56 = vmul.f32 0.5, %v212_v52 }
 0x1b1   :  { %v221_v55 = vmul.f32 %v199_v54, %v606_v6 }
 0x1b2   :  { %v214_v58 = vsub.f32 1.5, %v213_v56 }
 0x1b3   :  { %391 = vmatmul.msk.f32.gmra.mxu2 %vm128_vm1, %v221_v55 }
 0x1b4   :  { %v215_v61 = vmul.f32 %v429_v48, %v214_v58 }
 0x1b6   :  { %v219_v62 = vsel %vm218_vm14, %v429_v48, %v215_v61 }
 0x1b7   :  { %v223_v63 = vmul.f32 %v219_v62, %v614_v13 }
 0x1bb   :  { %392 = vmatmul.msk.f32.gmra.mxu2 %vm128_vm1, %v222_v60 }
 0x1c3   :  { %393 = vmatmul.msk.f32.gmra.mxu2 %vm128_vm1, %v223_v63 }
 0x22e   :  { %v261_v1 = vpop.f32.mrf.mxu2 }
 0x22f   :  { %v262_v2 = vadd.f32 %v419_v0, %v261_v1 }
 0x231   :  { %v394_v3 = vmul.f32 -1.442695, %v262_v2 }
 0x233   :  { %430 = vpow2.f32 %v394_v3 }
 0x236   :  { %v264_v4 = vpop.f32.mrf.mxu2 }
 0x237   :  { %v265_v5 = vadd.f32 %v419_v0, %v264_v4 }
 0x239   :  { %v395_v6 = vmul.f32 -1.442695, %v265_v5  ;;  %v431_v7 = vpop.eup %430 }
 0x23a   :  { %v285_v8 = vadd.f32 1.0, %v431_v7 }
 0x23b   :  { %432 = vpow2.f32 %v395_v6 }
 0x23c   :  { %434 = vrcp.f32 %v285_v8  ;;  %v298_v34 = vand.u32 2147483647, %v285_v8  ;;  %vm294_vm3 = vweird.f32 %v285_v8  ;;  %v300_v40 = vand.u32 2147483648, %v285_v8 }
 0x23e   :  { %v267_v9 = vpop.f32.mrf.mxu2  ;;  %vm299_vm7 = vcmp.eq.f32.partialorder %v298_v34, 8.507059e+37  ;;  %v301_v51 = vor.u32 1.1754944e-38, %v300_v40 }
 0x23f   :  { %v268_v10 = vadd.f32 %v419_v0, %v267_v9 }
 0x241   :  { %v433_v11 = vpop.eup %432  ;;  %v396_v12 = vmul.f32 -1.442695, %v268_v10 }
 0x242   :  { %v286_v13 = vadd.f32 1.0, %v433_v11  ;;  %v435_v16 = vpop.eup %434 }
 0x243   :  { %436 = vpow2.f32 %v396_v12  ;;  %v290_v22 = vmul.f32 %v435_v16, %v285_v8  ;;  %vm295_vm0 = vweird.f32 %v435_v16 }
 0x244   :  { %438 = vrcp.f32 %v286_v13  ;;  %vm309_vm1 = vweird.f32 %v286_v13  ;;  %v315_v35 = vand.u32 2147483648, %v286_v13  ;;  %v313_v37 = vand.u32 2147483647, %v286_v13  ;;  %vm646_vm5 = vmor %vm294_vm3, %vm295_vm0 }
 0x245   :  { %v291_v25 = vsub.f32 1.0, %v290_v22 }
 0x246   :  { %v270_v14 = vpop.f32.mrf.mxu2  ;;  %v316_v47 = vor.u32 1.1754944e-38, %v315_v35  ;;  %vm314_vm9 = vcmp.eq.f32.partialorder %v313_v37, 8.507059e+37 }
 0x247   :  { %v271_v15 = vadd.f32 %v419_v0, %v270_v14  ;;  %v292_v30 = vmul.f32 %v435_v16, %v291_v25 }
 0x249   :  { %v437_v17 = vpop.eup %436  ;;  %v397_v18 = vmul.f32 -1.442695, %v271_v15  ;;  %v293_v36 = vadd.f32 %v435_v16, %v292_v30 }
 0x24a   :  { %v439_v19 = vpop.eup %438  ;;  %v287_v20 = vadd.f32 1.0, %v437_v17 }
 0x24b   :  { %v305_v21 = vmul.f32 %v439_v19, %v286_v13  ;;  %440 = vpow2.f32 %v397_v18  ;;  %vm310_vm15 = vweird.f32 %v439_v19  ;;  %v297_v48 = vsel %vm646_vm5, %v435_v16, %v293_v36 }
 0x24c   :  { %442 = vrcp.f32 %v287_v20  ;;  %vm642_vm4 = vmor %vm309_vm1, %vm310_vm15  ;;  %v330_v42 = vand.u32 2147483648, %v287_v20  ;;  %vm324_vm6 = vweird.f32 %v287_v20  ;;  %v328_v46 = vand.u32 2147483647, %v287_v20 }
 0x24d   :  { %v306_v23 = vsub.f32 1.0, %v305_v21  ;;  %v302_v57 = vsel %vm299_vm7, %v301_v51, %v297_v48 }
 0x24e   :  { %v331_v53 = vor.u32 1.1754944e-38, %v330_v42  ;;  %vm329_vm10 = vcmp.eq.f32.partialorder %v328_v46, 8.507059e+37  ;;  %vm349_vm0 = vcmp.gt.f32.partialorder %v302_v57, 0.001 }
 0x24f   :  { %v307_v29 = vmul.f32 %v439_v19, %v306_v23  ;;  %v353_v0 = vsel %vm349_vm0, %v302_v57, 0.0 }
 0x251   :  { %v441_v24 = vpop.eup %440  ;;  %v308_v32 = vadd.f32 %v439_v19, %v307_v29 }
 0x252   :  { %v443_v26 = vpop.eup %442  ;;  %v288_v27 = vadd.f32 1.0, %v441_v24 }
 0x253   :  { %v320_v28 = vmul.f32 %v443_v26, %v287_v20  ;;  %vm325_vm2 = vweird.f32 %v443_v26  ;;  %v312_v45 = vsel %vm642_vm4, %v439_v19, %v308_v32 }
 0x254   :  { %444 = vrcp.f32 %v288_v27  ;;  %vm326_vm8 = vmor %vm324_vm6, %vm325_vm2  ;;  %v317_v52 = vsel %vm314_vm9, %v316_v47, %v312_v45  ;;  %v345_v54 = vand.u32 2147483648, %v288_v27  ;;  %v343_v56 = vand.u32 2147483647, %v288_v27 }
 0x255   :  { %v321_v31 = vsub.f32 1.0, %v320_v28  ;;  %vm339_vm12 = vweird.f32 %v288_v27  ;;  %vm350_vm13 = vcmp.gt.f32.partialorder %v317_v52, 0.001 }
 0x256   :  { %v346_v60 = vor.u32 1.1754944e-38, %v345_v54  ;;  %vm344_vm15 = vcmp.eq.f32.partialorder %v343_v56, 8.507059e+37  ;;  %v354_v63 = vsel %vm350_vm13, %v317_v52, 0.0 }
 0x257   :  { %v322_v33 = vmul.f32 %v443_v26, %v321_v31  ;;  %v357_v3 = vmax.f32 %v353_v0, %v354_v63 }
 0x259   :  { %v323_v38 = vadd.f32 %v443_v26, %v322_v33 }
 0x25a   :  { %v445_v39 = vpop.eup %444 }
 0x25b   :  { %v335_v43 = vmul.f32 %v445_v39, %v288_v27  ;;  %v327_v49 = vsel %vm326_vm8, %v443_v26, %v323_v38  ;;  %vm340_vm11 = vweird.f32 %v445_v39 }
 0x25c   :  { %v332_v58 = vsel %vm329_vm10, %v331_v53, %v327_v49  ;;  %vm341_vm14 = vmor %vm339_vm12, %vm340_vm11 }
 0x25d   :  { %v336_v50 = vsub.f32 1.0, %v335_v43  ;;  %vm351_vm1 = vcmp.gt.f32.partialorder %v332_v58, 0.001 }
 0x25e   :  { %v355_v1 = vsel %vm351_vm1, %v332_v58, 0.0 }
 0x25f   :  { %v337_v55 = vmul.f32 %v445_v39, %v336_v50 }
 0x261   :  { %v338_v59 = vadd.f32 %v445_v39, %v337_v55 }
 0x263   :  { %v342_v61 = vsel %vm341_vm14, %v445_v39, %v338_v59 }
 0x264   :  { %v347_v62 = vsel %vm344_vm15, %v346_v60, %v342_v61 }
 0x265   :  { %vm352_vm2 = vcmp.gt.f32.partialorder %v347_v62, 0.001 }
 0x266   :  { %v356_v2 = vsel %vm352_vm2, %v347_v62, 0.0 }
 0x267   :  { %v358_v4 = vmax.f32 %v355_v1, %v356_v2 }
 0x269   :  { %v359_v5 = vmax.f32 %v357_v3, %v358_v4 }
 0x26b   :  { %360 = vmax.xlane.f32.xlu2 %v359_v5 }
 0x2de   :  { %v361_v6 = vpop.xlane.xlu2 %360 }
 0x2df   :  { %v362_v7 = vrot.slane %v361_v6, 4 }
 0x2e1   :  { %v363_v8 = vmax.f32 %v361_v6, %v362_v7 }
 0x2e3   :  { %v364_v9 = vrot.slane %v363_v8, 2 }
 0x2e5   :  { %v365_v10 = vmax.f32 %v363_v8, %v364_v9 }
 0x2e7   :  { %v366_v11 = vrot.slane %v365_v10, 1 }
 0x2e9   :  { %v367_v12 = vmax.f32 %v365_v10, %v366_v11 }
 0x2eb   :  { %414 = vpush %v367_v12 }
 0x31c   :  { %s415_s17 = spop %414 }
 0x31d   :  { %370 = sst [smem:[#allocation2]] %s415_s17 }
 0x31e   :  { %379 = dma.smem_to_hbm %s461_s18, 16, %s377_s16, [#allocation3]  }
 0x31f   :  { %458 = dma.done.wait [#allocation3], 16  }
 0x320   :  { %459 = vsyncadd [#allocation3], 4294967280 }
 0x321   :  { %384 = sfence }
 0x322   :  { %385 = vsyncpa [#allocation3], 1 }

</bundles_post_ra>
